<compile_context>
chip_gen: v7x
topology: tpu7x:2x2x1
jax: 0.10.0
libtpu: 0.0.40
codegen_flags: <defaults>
</compile_context>

<pallas_src>
import functools

import jax
import jax.numpy as jnp
from jax.experimental import pallas as pl
from jax.experimental.pallas import tpu as pltpu

_LANE = 128  # vreg lane width


def _round_up(x, m):
    return ((x + m - 1) // m) * m


# ----------------------------- Pallas kernel --------------------------------
def _generate_kernel(tok_ref, img_ref, embed_ref, w_img_ref, w_out_ref, ids_ref):
    """Fused: instr = mean(embed[tok]); h = img@w_img + instr; ids = argmax(h@w_out)."""
    seq = tok_ref.shape[0]
    vocab, _ = embed_ref.shape

    # --- instruction embedding: mean_i embed[tok_i] == (count/seq) @ embed ------
    lane_v = jax.lax.broadcasted_iota(jnp.int32, (1, vocab), 1)
    cnt = jnp.zeros((1, vocab), jnp.float32)
    for i in range(seq):                                   # static, unrolled at trace time
        cnt = cnt + jnp.where(lane_v == tok_ref[i], 1.0, 0.0)   # tok_ref[i]: SMEM scalar
    instr = jnp.dot(cnt * (1.0 / seq), embed_ref[...],
                    preferred_element_type=jnp.float32)    # (1, H) f32

    # --- image projection: (B, D) bf16 @ (D, H) bf16 -> f32 (MXU) ---------------
    img = img_ref[...].astype(jnp.bfloat16)                # cast in-kernel, no wrapper copy
    h = jnp.dot(img, w_img_ref[...], preferred_element_type=jnp.float32)   # (B, H) f32
    h = h + instr                                          # VPU sublane-broadcast add

    # --- output projection into the lane-padded vocab ---------------------------
    logits = jnp.dot(h.astype(jnp.bfloat16), w_out_ref[...],
                     preferred_element_type=jnp.float32)   # (B, V_pad) f32

    # --- in-kernel argmax over real vocab lanes (low-index tie-break) -----------
    lanes = jax.lax.broadcasted_iota(jnp.int32, logits.shape, 1)
    logits = jnp.where(lanes < vocab, logits, -jnp.inf)    # mask zero-padded vocab lanes
    m = jnp.max(logits, axis=-1, keepdims=True)            # XLU lane reduce
    ids = jnp.min(jnp.where(logits == m, lanes, jnp.int32(logits.shape[-1])),
                  axis=-1, keepdims=True)                  # (B, 1) int32

    # Lane-dense store; column 0 is read back by the wrapper.
    ids_ref[...] = jnp.broadcast_to(ids, ids_ref.shape)


def fused_generate(tok, img_flat, embed, w_img, w_out_pad):
    """tok:(S,)i32, img_flat:(B,D)f32, embed:(V,H)f32, w_img:(D,H)bf16, w_out_pad:(H,V_pad)bf16."""
    b = img_flat.shape[0]
    v_pad = w_out_pad.shape[1]
    smem = pl.BlockSpec(memory_space=pltpu.MemorySpace.SMEM)   # token ids -> SMEM scalars
    vmem = pl.BlockSpec(memory_space=pltpu.MemorySpace.VMEM)   # full array, VMEM-resident
    return pl.pallas_call(
        _generate_kernel,
        out_shape=jax.ShapeDtypeStruct((b, v_pad), jnp.int32),
        in_specs=[smem, vmem, vmem, vmem, vmem],
        out_specs=vmem,
        # gridless: single invocation, no per-step grid bookkeeping or double-buffering
    )(tok, img_flat, embed, w_img, w_out_pad)


# --------------------------- jitted hot path ---------------------------------
@jax.jit
def _generate_jit(tok, imgs, embed, w_img, w_out_pad):
    b = imgs.shape[0]
    img_flat = imgs.reshape(b, -1)                        # NCHW -> (B, C*H*W), pure reshape
    ids = fused_generate(tok, img_flat, embed, w_img, w_out_pad)   # (B, V_pad) int32
    return ids[:, 0]                                      # (B,) int32 token ids


# ----------------------------- Module port -----------------------------------
class VisITBaseModel:
    """Faithful port: forward delegates to generate; generate is abstract."""

    def __init__(self):
        pass

    def forward(self, instruction, images):
        return self.generate(instruction, images)

    __call__ = forward

    def generate(self, instruction, images):
        """
        instruction: (str) a string of instruction
        images: (list) a list of images
        Return: (str) a string of generated response
        """
        raise NotImplementedError


class VisITPallasModel(VisITBaseModel):
    # TODO(synk): reference generate() is abstract (raises NotImplementedError);
    # this concrete subclass supplies a deterministic synthetic generate so the
    # Pallas hot path can be exercised — it is NOT a real MiniGPT-4 checkpoint.
    VOCAB = "abcdefghijklmnopqrstuvwxyz012345"  # 32 symbols

    def __init__(self, hidden=32, vocab=32, img_dim=4 * 16 * 16, seq=8):
        super().__init__()
        key = jax.random.PRNGKey(0)
        k1, k2, k3 = jax.random.split(key, 3)
        w_img = jax.random.normal(k1, (img_dim, hidden), jnp.float32) * 0.02
        self.embed = jax.random.normal(k2, (vocab, hidden), jnp.float32) * 0.02   # f32 table
        w_out = jax.random.normal(k3, (hidden, vocab), jnp.float32) * 0.02

        # Separate (de-fused) weights, bf16 for the MXU; vocab lane-padded 32 -> 128.
        v_pad = max(_LANE, _round_up(vocab, _LANE))
        self.w_img = w_img.astype(jnp.bfloat16)                                   # (D, H)
        self.w_out_pad = jnp.pad(w_out, ((0, 0), (0, v_pad - vocab))).astype(jnp.bfloat16)  # (H, V_pad)

        self.seq = seq
        self.vocab_size = vocab

    def _tokenize(self, instruction: str):
        ids = [ord(c) % self.vocab_size for c in instruction][: self.seq]
        ids = ids + [0] * (self.seq - len(ids))
        return jnp.asarray(ids, dtype=jnp.int32)

    def generate(self, instruction, images):
        # instruction: str; images: list of NCHW arrays (stand-in for image urls)
        tok = self._tokenize(instruction)
        imgs = jnp.stack(images, axis=0).astype(jnp.float32)          # (B, C, H, W) NCHW
        ids = _generate_jit(tok, imgs, self.embed, self.w_img, self.w_out_pad)
        ids = jax.device_get(ids)                                     # syncs; no extra blocking op
        return "".join(self.VOCAB[int(i)] for i in ids)


# ------------------------------- Demo ----------------------------------------
if __name__ == "__main__":
    key = jax.random.PRNGKey(0)
    k_img0, k_img1 = jax.random.split(key)
    # two "images", NCHW = (4, 16, 16) each  ->  batch (2, 4, 16, 16)
    images = [
        jax.random.normal(k_img0, (4, 16, 16), jnp.float32),
        jax.random.normal(k_img1, (4, 16, 16), jnp.float32),
    ]
    instruction = "describe the image"

    model = VisITPallasModel()

    # Run the jitted Pallas hot path once and block on the device result.
    ids_dev = _generate_jit(model._tokenize(instruction),
                            jnp.stack(images, axis=0).astype(jnp.float32),
                            model.embed, model.w_img, model.w_out_pad)
    jax.block_until_ready(ids_dev)

    # Full forward -> generate -> Pallas kernel -> string response.
    response = model(instruction, images)
    assert isinstance(response, str) and len(response) == len(images)
    print("KERNEL_OK")
</pallas_src>

<mosaic_0001>
module attributes {stable_mosaic.version = 11 : i64} {
  func.func @_generate_kernel(%arg0: memref<8xi32, #tpu.memory_space<smem>>, %arg1: memref<2x1024xf32, #tpu.memory_space<vmem>>, %arg2: memref<32x32xf32, #tpu.memory_space<vmem>>, %arg3: memref<1024x32xbf16, #tpu.memory_space<vmem>>, %arg4: memref<32x128xbf16, #tpu.memory_space<vmem>>, %arg5: memref<2x128xi32, #tpu.memory_space<vmem>>) attributes {dimension_semantics = [], scalar_prefetch = 0 : i64, scratch_operands = 0 : i64, tpu.core_type = #tpu.core_type<tc>} {
    %0 = tpu.iota {dimensions = array<i32: 1>} : vector<1x32xi32>
    %cst = arith.constant 0.000000e+00 : f32
    %1 = vector.broadcast %cst : f32 to vector<1x32xf32>
    %c0 = arith.constant 0 : index
    %2 = memref.load %arg0[%c0] : memref<8xi32, #tpu.memory_space<smem>>
    %3 = vector.broadcast %2 : i32 to vector<1x32xi32>
    %4 = arith.cmpi eq, %0, %3 : vector<1x32xi32>
    %cst_0 = arith.constant 1.000000e+00 : f32
    %cst_1 = arith.constant 0.000000e+00 : f32
    %5 = vector.broadcast %cst_0 : f32 to vector<1x32xf32>
    %6 = vector.broadcast %cst_1 : f32 to vector<1x32xf32>
    %7 = arith.select %4, %5, %6 : vector<1x32xi1>, vector<1x32xf32>
    %8 = arith.addf %1, %7 : vector<1x32xf32>
    %c1 = arith.constant 1 : index
    %9 = memref.load %arg0[%c1] : memref<8xi32, #tpu.memory_space<smem>>
    %10 = vector.broadcast %9 : i32 to vector<1x32xi32>
    %11 = arith.cmpi eq, %0, %10 : vector<1x32xi32>
    %cst_2 = arith.constant 1.000000e+00 : f32
    %cst_3 = arith.constant 0.000000e+00 : f32
    %12 = vector.broadcast %cst_2 : f32 to vector<1x32xf32>
    %13 = vector.broadcast %cst_3 : f32 to vector<1x32xf32>
    %14 = arith.select %11, %12, %13 : vector<1x32xi1>, vector<1x32xf32>
    %15 = arith.addf %8, %14 : vector<1x32xf32>
    %c2 = arith.constant 2 : index
    %16 = memref.load %arg0[%c2] : memref<8xi32, #tpu.memory_space<smem>>
    %17 = vector.broadcast %16 : i32 to vector<1x32xi32>
    %18 = arith.cmpi eq, %0, %17 : vector<1x32xi32>
    %cst_4 = arith.constant 1.000000e+00 : f32
    %cst_5 = arith.constant 0.000000e+00 : f32
    %19 = vector.broadcast %cst_4 : f32 to vector<1x32xf32>
    %20 = vector.broadcast %cst_5 : f32 to vector<1x32xf32>
    %21 = arith.select %18, %19, %20 : vector<1x32xi1>, vector<1x32xf32>
    %22 = arith.addf %15, %21 : vector<1x32xf32>
    %c3 = arith.constant 3 : index
    %23 = memref.load %arg0[%c3] : memref<8xi32, #tpu.memory_space<smem>>
    %24 = vector.broadcast %23 : i32 to vector<1x32xi32>
    %25 = arith.cmpi eq, %0, %24 : vector<1x32xi32>
    %cst_6 = arith.constant 1.000000e+00 : f32
    %cst_7 = arith.constant 0.000000e+00 : f32
    %26 = vector.broadcast %cst_6 : f32 to vector<1x32xf32>
    %27 = vector.broadcast %cst_7 : f32 to vector<1x32xf32>
    %28 = arith.select %25, %26, %27 : vector<1x32xi1>, vector<1x32xf32>
    %29 = arith.addf %22, %28 : vector<1x32xf32>
    %c4 = arith.constant 4 : index
    %30 = memref.load %arg0[%c4] : memref<8xi32, #tpu.memory_space<smem>>
    %31 = vector.broadcast %30 : i32 to vector<1x32xi32>
    %32 = arith.cmpi eq, %0, %31 : vector<1x32xi32>
    %cst_8 = arith.constant 1.000000e+00 : f32
    %cst_9 = arith.constant 0.000000e+00 : f32
    %33 = vector.broadcast %cst_8 : f32 to vector<1x32xf32>
    %34 = vector.broadcast %cst_9 : f32 to vector<1x32xf32>
    %35 = arith.select %32, %33, %34 : vector<1x32xi1>, vector<1x32xf32>
    %36 = arith.addf %29, %35 : vector<1x32xf32>
    %c5 = arith.constant 5 : index
    %37 = memref.load %arg0[%c5] : memref<8xi32, #tpu.memory_space<smem>>
    %38 = vector.broadcast %37 : i32 to vector<1x32xi32>
    %39 = arith.cmpi eq, %0, %38 : vector<1x32xi32>
    %cst_10 = arith.constant 1.000000e+00 : f32
    %cst_11 = arith.constant 0.000000e+00 : f32
    %40 = vector.broadcast %cst_10 : f32 to vector<1x32xf32>
    %41 = vector.broadcast %cst_11 : f32 to vector<1x32xf32>
    %42 = arith.select %39, %40, %41 : vector<1x32xi1>, vector<1x32xf32>
    %43 = arith.addf %36, %42 : vector<1x32xf32>
    %c6 = arith.constant 6 : index
    %44 = memref.load %arg0[%c6] : memref<8xi32, #tpu.memory_space<smem>>
    %45 = vector.broadcast %44 : i32 to vector<1x32xi32>
    %46 = arith.cmpi eq, %0, %45 : vector<1x32xi32>
    %cst_12 = arith.constant 1.000000e+00 : f32
    %cst_13 = arith.constant 0.000000e+00 : f32
    %47 = vector.broadcast %cst_12 : f32 to vector<1x32xf32>
    %48 = vector.broadcast %cst_13 : f32 to vector<1x32xf32>
    %49 = arith.select %46, %47, %48 : vector<1x32xi1>, vector<1x32xf32>
    %50 = arith.addf %43, %49 : vector<1x32xf32>
    %c7 = arith.constant 7 : index
    %51 = memref.load %arg0[%c7] : memref<8xi32, #tpu.memory_space<smem>>
    %52 = vector.broadcast %51 : i32 to vector<1x32xi32>
    %53 = arith.cmpi eq, %0, %52 : vector<1x32xi32>
    %cst_14 = arith.constant 1.000000e+00 : f32
    %cst_15 = arith.constant 0.000000e+00 : f32
    %54 = vector.broadcast %cst_14 : f32 to vector<1x32xf32>
    %55 = vector.broadcast %cst_15 : f32 to vector<1x32xf32>
    %56 = arith.select %53, %54, %55 : vector<1x32xi1>, vector<1x32xf32>
    %57 = arith.addf %50, %56 : vector<1x32xf32>
    %cst_16 = arith.constant 1.250000e-01 : f32
    %58 = vector.broadcast %cst_16 : f32 to vector<1x32xf32>
    %59 = arith.mulf %57, %58 : vector<1x32xf32>
    %c0_17 = arith.constant 0 : index
    %c0_18 = arith.constant 0 : index
    %60 = vector.load %arg2[%c0_17, %c0_18] : memref<32x32xf32, #tpu.memory_space<vmem>>, vector<32x32xf32>
    %cst_19 = arith.constant dense<0.000000e+00> : vector<1x32xf32>
    %61 = tpu.matmul %59, %60, %cst_19 {dimension_numbers = #tpu.dot_dimension_numbers<[1], [0], [0], [1], [0, 0, 1, 1], [], []>} : vector<1x32xf32>, vector<32x32xf32>, vector<1x32xf32> -> vector<1x32xf32>
    %c0_20 = arith.constant 0 : index
    %c0_21 = arith.constant 0 : index
    %62 = vector.load %arg1[%c0_20, %c0_21] : memref<2x1024xf32, #tpu.memory_space<vmem>>, vector<2x1024xf32>
    %63 = arith.truncf %62 : vector<2x1024xf32> to vector<2x1024xbf16>
    %c0_22 = arith.constant 0 : index
    %c0_23 = arith.constant 0 : index
    %64 = vector.load %arg3[%c0_22, %c0_23] : memref<1024x32xbf16, #tpu.memory_space<vmem>>, vector<1024x32xbf16>
    %cst_24 = arith.constant dense<0.000000e+00> : vector<2x32xf32>
    %65 = tpu.matmul %63, %64, %cst_24 {dimension_numbers = #tpu.dot_dimension_numbers<[1], [0], [0], [1], [0, 0, 1, 1], [], []>} : vector<2x1024xbf16>, vector<1024x32xbf16>, vector<2x32xf32> -> vector<2x32xf32>
    %66 = vector.broadcast %61 : vector<1x32xf32> to vector<2x32xf32>
    %67 = arith.addf %65, %66 : vector<2x32xf32>
    %68 = arith.truncf %67 : vector<2x32xf32> to vector<2x32xbf16>
    %c0_25 = arith.constant 0 : index
    %c0_26 = arith.constant 0 : index
    %69 = vector.load %arg4[%c0_25, %c0_26] : memref<32x128xbf16, #tpu.memory_space<vmem>>, vector<32x128xbf16>
    %cst_27 = arith.constant dense<0.000000e+00> : vector<2x128xf32>
    %70 = tpu.matmul %68, %69, %cst_27 {dimension_numbers = #tpu.dot_dimension_numbers<[1], [0], [0], [1], [0, 0, 1, 1], [], []>} : vector<2x32xbf16>, vector<32x128xbf16>, vector<2x128xf32> -> vector<2x128xf32>
    %71 = tpu.iota {dimensions = array<i32: 1>} : vector<2x128xi32>
    %c32_i32 = arith.constant 32 : i32
    %72 = vector.broadcast %c32_i32 : i32 to vector<2x128xi32>
    %73 = arith.cmpi slt, %71, %72 : vector<2x128xi32>
    %cst_28 = arith.constant 0xFF800000 : f32
    %74 = vector.broadcast %cst_28 : f32 to vector<2x128xf32>
    %75 = arith.select %73, %70, %74 : vector<2x128xi1>, vector<2x128xf32>
    %cst_29 = arith.constant dense<0xFF800000> : vector<2xf32>
    %76 = vector.multi_reduction <maximumf>, %75, %cst_29 [1] : vector<2x128xf32> to vector<2xf32>
    %77 = vector.shape_cast %76 : vector<2xf32> to vector<2x1xf32>
    %78 = vector.broadcast %77 : vector<2x1xf32> to vector<2x128xf32>
    %79 = arith.cmpf oeq, %75, %78 : vector<2x128xf32>
    %c128_i32 = arith.constant 128 : i32
    %80 = vector.broadcast %c128_i32 : i32 to vector<2x128xi32>
    %81 = arith.select %79, %71, %80 : vector<2x128xi1>, vector<2x128xi32>
    %cst_30 = arith.constant dense<2147483647> : vector<2xi32>
    %82 = vector.multi_reduction <minsi>, %81, %cst_30 [1] : vector<2x128xi32> to vector<2xi32>
    %83 = vector.shape_cast %82 : vector<2xi32> to vector<2x1xi32>
    %84 = vector.shape_cast %83 : vector<2x1xi32> to vector<2x1xi32>
    %85 = vector.broadcast %84 : vector<2x1xi32> to vector<2x128xi32>
    %c0_31 = arith.constant 0 : index
    %c0_32 = arith.constant 0 : index
    %86 = vector.load %arg5[%c0_31, %c0_32] : memref<2x128xi32, #tpu.memory_space<vmem>>, vector<2x128xi32>
    tpu.vector_store %arg5[%c0_31, %c0_32], %85 {strides = array<i32>} : memref<2x128xi32, #tpu.memory_space<vmem>>, vector<2x128xi32>,
    return
  }
}

</mosaic_0001>

<bundles_post_ra>
// kernel: _generate_jit.1
= control target key start
LH: loop header
LB: loop body
LE: loop exit
PB: predicated region body
PF: predicated region fallthrough
CT: control target
= control target key end

     0   :  { %10 = vsyncpa [#allocation3], 0  ;;  %s1564_s0 = inlined_call_operand.vmem [shape: s32[8], index: 0, kind: input, shape index: {}]   ;;  %s1565_s1 = inlined_call_operand.vmem [shape: f32[2,1024], index: 1, kind: input, shape index: {}]   ;;  %s1566_s2 = inlined_call_operand.vmem [shape: f32[32,32], index: 2, kind: input, shape index: {}]   ;;  %s1567_s3 = inlined_call_operand.vmem [shape: bf16[1024,32], index: 3, kind: input, shape index: {}]   ;;  %s1568_s4 = inlined_call_operand.vmem [shape: bf16[32,128], index: 4, kind: input, shape index: {}]   ;;  %s1569_s5 = inlined_call_operand.vmem [shape: s32[2,128], index: 5, kind: output, shape index: {}]  }
   0x1   :  { %s17_s20 = sshll.u32 %s1564_s0, 4  ;;  %s18_s20 = int_to_ptr.vmem [resolvable:$true] %s17_s20 }
   0x2   :  { %s1243_s21 = scalar_lea.vmem %s18_s20, 16  ;;  %p1248_p1 = scmp.lt.s32.totalorder %s18_s20, %s18_s20 }
   0x3   :  { %p1244_p0 = scmp.ne.s32.totalorder %s18_s20, %s1243_s21  ;;  %p1249_p2 = scmp.lt.s32.totalorder %s1243_s21, %s1243_s21 }
   0x5   :  { %p1250_p3 = por %p1249_p2, %p1248_p1 }
   0x7   :  { %p1251_p4 = pnand %p1250_p3, %p1244_p0 }
   0x9   :  { %1254 = shalt.err (!%p1251_p4)
}
   0xa   :  { %s1257_s22 = smov [#allocation2]  }
   0xb   :  { %20 = dma.vmem_to_smem %s18_s20, 16, %s1257_s22, [#allocation3]  }
   0xc   :  { %1255 = dma.done.wait [#allocation3], 16  }
   0xd   :  { %1256 = vsyncadd [#allocation3], 4294967280 }
   0xe   :  { %32 = sfence }
   0xf   :  { %v1175_v0 = vld [vmem:[%s1567_s3 + $0x40] sm:$0xff]   ;;  %v1258_v2 = vmov 0.0|0.0   ;;  %v1177_v3 = vld [vmem:[%s1567_s3 + $0x48] sm:$0xff]   ;;  %vm1259_vm0 = vmmov 0   ;;  %v1260_v5 = vmov 0.0   ;;  %v1179_v6 = vld [vmem:[%s1567_s3 + $0x50] sm:$0xff]   ;;  %v34_v9 = vlaneseq }
  0x10   :  { %v1176_v1 = vld [vmem:[%s1567_s3] sm:$0xff]   ;;  %1164 = vmatprep.subr.bf16.mxu0 %v1258_v2  ;;  %1054 = vmatprep.subr.bf16.mxu1 %v1175_v0  ;;  %v1178_v4 = vld [vmem:[%s1567_s3 + $0x8] sm:$0xff]   ;;  %v1180_v7 = vld [vmem:[%s1567_s3 + $0x10] sm:$0xff]   ;;  %s36_s15 = sld [smem:[#allocation2]]  ;;  %s974_s20 = sld [smem:[#allocation2 + $0x1]]  ;;  %vm81_vm9 = vcmask 261120  }
  0x11   :  { %1055 = vmatpush3.bf16.msra.mxu1 %v1176_v1  ;;  %1153 = vmatprep.mubr.msk.f32.mxu0 %vm1259_vm0, %v1260_v5  ;;  %v1181_v8 = vld [vmem:[%s1567_s3 + $0x58] sm:$0xff]   ;;  %v77_v10 = vld [vmem:[%s1566_s2] sm:$0xff]  ;;  %v78_v11 = vld [vmem:[%s1566_s2 + $0x8] sm:$0xff]  ;;  %v1333_v16 = vand.u32 127, %v34_v9  ;;  %s975_s28 = sld [smem:[#allocation2 + $0x2]]  ;;  %s977_s29 = sld [smem:[#allocation2 + $0x4]] }
  0x12   :  { %1056 = vmatprep.subr.bf16.mxu1 %v1177_v3  ;;  %v1165_v12 = vpack.c.bf16 %v78_v11, %v77_v10  ;;  %v1182_v13 = vld [vmem:[%s1567_s3 + $0x18] sm:$0xff]   ;;  %v79_v14 = vld [vmem:[%s1566_s2 + $0x10] sm:$0xff]  ;;  %v1183_v17 = vld [vmem:[%s1567_s3 + $0x60] sm:$0xff]   ;;  %s978_s30 = sld [smem:[#allocation2 + $0x5]]  ;;  %s1349_s8 = sld [smem:[#allocation2 + $0x6]]  ;;  %v1371_v38 = vshrl.u32 %v34_v9, 7 }
  0x13   :  { %v80_v15 = vld [vmem:[%s1566_s2 + $0x18] sm:$0xff]  ;;  %v1184_v19 = vld [vmem:[%s1567_s3 + $0x20] sm:$0xff]   ;;  %s976_s2 = sld [smem:[#allocation2 + $0x3]]  ;;  %v1185_v22 = vld [vmem:[%s1567_s3 + $0x68] sm:$0xff]   ;;  %s1351_s9 = sld [smem:[#allocation2 + $0x7]]  ;;  %vm945_vm10 = vcmp.lt.s32.totalorder %v1333_v16, 32 }
  0x14   :  { %1166 = vmatpush3.bf16.msra.mxu0 %v1165_v12  ;;  %v1168_v18 = vpack.c.bf16 %v80_v15, %v79_v14  ;;  %v1187_v20 = vld [vmem:[%s1567_s3 + $0xc0] sm:$0xff]   ;;  %v1186_v25 = vld [vmem:[%s1567_s3 + $0x28] sm:$0xff]   ;;  %v1189_v28 = vld [vmem:[%s1567_s3 + $0x70] sm:$0xff]   ;;  %v1261_v42 = vmov 1983009808   ;;  %vm947_vm11 = vcmask 1041408  }
  0x15   :  { %1057 = vmatpush3.bf16.msra.mxu1 %v1178_v4  ;;  %1167 = vmatprep.subr.bf16.mxu0 %v1258_v2  ;;  %v1190_v37 = vld [vmem:[%s1567_s3 + $0x30] sm:$0xff]   ;;  %v1193_v41 = vld [vmem:[%s1567_s3 + $0x78] sm:$0xff]   ;;  %v161_v43 = vunpack.c.l.s4 %v1261_v42  ;;  %v155_v46 = vld [vmem:[%s1565_s1] sm:$0xff] }
  0x16   :  { %1058 = vmatprep.subr.bf16.mxu1 %v1179_v6  ;;  %v37_v21 = vstv %s36_s15  ;;  %v42_v24 = vstv %s974_s20  ;;  %v1194_v49 = vld [vmem:[%s1567_s3 + $0x38] sm:$0xff]   ;;  %v159_v50 = vcombine.high %v155_v46, %v155_v46  ;;  %v1198_v53 = vld [vmem:[%s1567_s3 + $0x140] sm:$0xff]  }
  0x17   :  { %vm38_vm1 = vcmp.eq.s32.totalorder %v1333_v16, %v37_v21  ;;  %vm43_vm2 = vcmp.eq.s32.totalorder %v1333_v16, %v42_v24  ;;  %v47_v29 = vstv %s975_s28  ;;  %v57_v31 = vstv %s977_s29  ;;  %v1188_v59 = vld [vmem:[%s1567_s3 + $0x80] sm:$0xff]   ;;  %v1191_v63 = vld [vmem:[%s1567_s3 + $0xc8] sm:$0xff]  }
  0x18   :  { %1169 = vmatpush3.bf16.msra.mxu0 %v1168_v18  ;;  %v39_v23 = vsel %vm38_vm1, 1.0, %v1260_v5  ;;  %v44_v26 = vsel %vm43_vm2, 1.0, %v1260_v5  ;;  %vm48_vm3 = vcmp.eq.s32.totalorder %v1333_v16, %v47_v29  ;;  %v62_v32 = vstv %s978_s30  ;;  %v1200_v2 = vld [vmem:[%s1567_s3 + $0x100] sm:$0xff]   ;;  %v1202_v4 = vld [vmem:[%s1567_s3 + $0x148] sm:$0xff]   ;;  %v1206_v10 = vld [vmem:[%s1567_s3 + $0x150] sm:$0xff]  }
  0x19   :  { %1059 = vmatpush3.bf16.msra.mxu1 %v1180_v7  ;;  %1076 = vmatprep.subr.bf16.mxu0 %v1187_v20  ;;  %v45_v27 = vadd.f32 %v44_v26, %v39_v23  ;;  %v52_v30 = vstv %s976_s2  ;;  %v49_v33 = vsel %vm48_vm3, 1.0, %v1260_v5  ;;  %vm58_vm5 = vcmp.eq.s32.totalorder %v1333_v16, %v57_v31  ;;  %v1192_v6 = vld [vmem:[%s1567_s3 + $0x88] sm:$0xff]   ;;  %v1196_v11 = vld [vmem:[%s1567_s3 + $0x90] sm:$0xff]   ;;  %v1199_v12 = vld [vmem:[%s1567_s3 + $0xd8] sm:$0xff]  }
  0x1a   :  { %1060 = vmatprep.subr.bf16.mxu1 %v1181_v8  ;;  %vm53_vm4 = vcmp.eq.s32.totalorder %v1333_v16, %v52_v30  ;;  %vm63_vm6 = vcmp.eq.s32.totalorder %v1333_v16, %v62_v32  ;;  %v67_v36 = vstv %s1349_s8  ;;  %v59_v39 = vsel %vm58_vm5, 1.0, %v1260_v5  ;;  %v1195_v8 = vld [vmem:[%s1567_s3 + $0xd0] sm:$0xff]   ;;  %v1204_v9 = vld [vmem:[%s1567_s3 + $0x108] sm:$0xff]   ;;  %v1210_v14 = vld [vmem:[%s1567_s3 + $0x158] sm:$0xff]  }
  0x1b   :  { %v54_v34 = vsel %vm53_vm4, 1.0, %v1260_v5  ;;  %v50_v35 = vadd.f32 %v49_v33, %v45_v27  ;;  %v72_v40 = vstv %s1351_s9  ;;  %vm68_vm7 = vcmp.eq.s32.totalorder %v1333_v16, %v67_v36  ;;  %v1201_v15 = vld [vmem:[%s1567_s3 + $0x98] sm:$0xff]   ;;  %v1205_v20 = vld [vmem:[%s1567_s3 + $0xa0] sm:$0xff]   ;;  %v1207_v21 = vld [vmem:[%s1567_s3 + $0xe8] sm:$0xff]  }
  0x1c   :  { %v64_v45 = vsel %vm63_vm6, 1.0, %v1260_v5  ;;  %v162_v47 = vunpack.c.0.s8 %v161_v43  ;;  %vm73_vm8 = vcmp.eq.s32.totalorder %v1333_v16, %v72_v40  ;;  %v69_v51 = vsel %vm68_vm7, 1.0, %v1260_v5  ;;  %v1212_v18 = vld [vmem:[%s1567_s3 + $0x118] sm:$0xff]   ;;  %v1218_v23 = vld [vmem:[%s1567_s3 + $0x168] sm:$0xff]   ;;  %v1222_v27 = vld [vmem:[%s1567_s3 + $0x170] sm:$0xff]  }
  0x1d   :  { %1061 = vmatpush3.bf16.msra.mxu1 %v1182_v13  ;;  %v55_v44 = vadd.f32 %v54_v34, %v50_v35  ;;  %v74_v55 = vsel %vm73_vm8, 1.0, %v1260_v5  ;;  %v1208_v13 = vld [vmem:[%s1567_s3 + $0x110] sm:$0xff]   ;;  %v1209_v24 = vld [vmem:[%s1567_s3 + $0xa8] sm:$0xff]   ;;  %v1215_v29 = vld [vmem:[%s1567_s3 + $0xf8] sm:$0xff]  }
  0x1e   :  { %1062 = vmatprep.subr.bf16.mxu1 %v1183_v17  ;;  %v1389_v52 = vsub.s32 %v162_v47, %v1371_v38  ;;  %v1203_v17 = vld [vmem:[%s1567_s3 + $0xe0] sm:$0xff]   ;;  %v1219_v26 = vld [vmem:[%s1567_s3 + $0x128] sm:$0xff]   ;;  %v1223_v30 = vld [vmem:[%s1567_s3 + $0x130] sm:$0xff]  }
  0x1f   :  { %v60_v48 = vadd.f32 %v59_v39, %v55_v44  ;;  %v156_v31 = vld [vmem:[%s1565_s1 + $0x8] sm:$0xff]  ;;  %v1226_v32 = vld [vmem:[%s1567_s3 + $0x178] sm:$0xff]   ;;  %v1220_v40 = vld [vmem:[%s1567_s3 + $0x1c0] sm:$0xff]  }
  0x20   :  { %v166_v56 = vrot.slane %v155_v46, %v1389_v52  ;;  %v1397_v57 = vrot.slane %v159_v50, %v1389_v52  ;;  %v183_v33 = vrot.slane %v156_v31, %v1389_v52  ;;  %v176_v34 = vcombine.high %v156_v31, %v156_v31  ;;  %v1217_v35 = vld [vmem:[%s1567_s3 + $0xb8] sm:$0xff]   ;;  %v1224_v47 = vld [vmem:[%s1567_s3 + $0x1c8] sm:$0xff]   ;;  %v1229_v50 = vld [vmem:[%s1567_s3 + $0x190] sm:$0xff]  }
  0x21   :  { %1063 = vmatpush3.bf16.msra.mxu1 %v1184_v19  ;;  %v65_v54 = vadd.f32 %v64_v45, %v60_v48  ;;  %v1214_v19 = vld [vmem:[%s1567_s3 + $0x160] sm:$0xff]   ;;  %v1227_v39 = vld [vmem:[%s1567_s3 + $0x138] sm:$0xff]   ;;  %v1225_v48 = vld [vmem:[%s1567_s3 + $0x188] sm:$0xff]  }
  0x22   :  { %1064 = vmatprep.subr.bf16.mxu1 %v1185_v22  ;;  %v174_v60 = vcombine.high %v166_v56, %v166_v56  ;;  %v175_v61 = vcombine.high %v1397_v57, %v1397_v57  ;;  %v201_v0 = vpack.c.bf16 %v166_v56, %v166_v56  ;;  %v1216_v22 = vld [vmem:[%s1567_s3 + $0x120] sm:$0xff]   ;;  %v191_v36 = vcombine.high %v183_v33, %v183_v33  ;;  %v1235_v56 = vld [vmem:[%s1567_s3 + $0x1a8] sm:$0xff]  }
  0x23   :  { %v70_v58 = vadd.f32 %v69_v51, %v65_v54  ;;  %v203_v43 = vpack.c.bf16 %v1397_v57, %v1397_v57  ;;  %v205_v44 = vpack.c.bf16 %v183_v33, %v183_v33  ;;  %v1221_v45 = vld [vmem:[%s1567_s3 + $0x180] sm:$0xff]   ;;  %v1230_v51 = vld [vmem:[%s1567_s3 + $0x1d8] sm:$0xff]   ;;  %v1236_v57 = vld [vmem:[%s1567_s3 + $0x1f0] sm:$0xff]  }
  0x24   :  { %v202_v1 = vpack.c.bf16 %v174_v60, %v174_v60  ;;  %v204_v7 = vpack.c.bf16 %v175_v61, %v175_v61  ;;  %v1233_v54 = vld [vmem:[%s1567_s3 + $0x1a0] sm:$0xff]   ;;  %v1239_v60 = vld [vmem:[%s1567_s3 + $0x1b8] sm:$0xff]  }
  0x25   :  { %1065 = vmatpush3.bf16.msra.mxu1 %v1186_v25  ;;  %v75_v62 = vadd.f32 %v74_v55, %v70_v58  ;;  %v1211_v25 = vld [vmem:[%s1567_s3 + $0xf0] sm:$0xff]   ;;  %v1234_v55 = vld [vmem:[%s1567_s3 + $0x1e8] sm:$0xff]  }
  0x26   :  { %1066 = vmatprep.subr.bf16.mxu1 %v1189_v28  ;;  %757 = vmatprep.mubr.bf16.mxu1 %v202_v1  ;;  %v1213_v28 = vld [vmem:[%s1567_s3 + $0xb0] sm:$0xff]  }
  0x27   :  { %v76_v3 = vmul.f32 0.125, %v75_v62  ;;  %v1237_v58 = vld [vmem:[%s1567_s3 + $0x1b0] sm:$0xff]   ;;  %v1241_v62 = vld [vmem:[%s1568_s4] sm:$0xff]  }
  0x29   :  { %1067 = vmatpush3.bf16.msra.mxu1 %v1190_v37  ;;  %1154 = vmatmul.mubr.msk.f32.vlgmr.msra.gmra.mrb[0].mxu0 %vm81_vm9, %v76_v3  ;;  %v190_v37 = vrot.slane %v176_v34, %v1389_v52  ;;  %v1231_v52 = vld [vmem:[%s1567_s3 + $0x198] sm:$0xff]  }
  0x2a   :  { %1068 = vmatprep.subr.bf16.mxu1 %v1193_v41  ;;  %1077 = vmatpush3.bf16.msra.mxu0 %v1188_v59  ;;  %v206_v41 = vpack.c.bf16 %v191_v36, %v191_v36  ;;  %v1238_v59 = vld [vmem:[%s1567_s3 + $0x1f8] sm:$0xff]  }
  0x2b   :  { %1078 = vmatprep.subr.bf16.mxu0 %v1191_v63  ;;  %797 = vmatprep.mubr.bf16.mxu0 %v204_v7  ;;  %v192_v42 = vcombine.high %v190_v37, %v190_v37  ;;  %v207_v61 = vpack.c.bf16 %v190_v37, %v190_v37  ;;  %v1242_v63 = vld [vmem:[%s1568_s4 + $0x8] sm:$0xff]  }
  0x2d   :  { %1069 = vmatpush3.bf16.msra.mxu1 %v1194_v49  ;;  %v208_v46 = vpack.c.bf16 %v192_v42, %v192_v42  ;;  %v1228_v49 = vld [vmem:[%s1567_s3 + $0x1d0] sm:$0xff]  }
  0x2e   :  { %1098 = vmatprep.subr.bf16.mxu1 %v1198_v53  ;;  %1079 = vmatpush3.bf16.msra.mxu0 %v1192_v6  ;;  %v1232_v53 = vld [vmem:[%s1567_s3 + $0x1e0] sm:$0xff]  }
  0x2f   :  { %1080 = vmatprep.subr.bf16.mxu0 %v1195_v8 }
  0x30   :  { %758 = vmatmul.mubr.bf16.vlgmr.msra.gmra.mrb[0].mxu1 %v201_v0  ;;  %v339_v0 = vsub.s32 0, %v1371_v38 }
  0x31   :  { %1099 = vmatpush3.bf16.msra.mxu1 %v1200_v2  ;;  %837 = vmatprep.mubr.bf16.mxu1 %v206_v41 }
  0x32   :  { %1100 = vmatprep.subr.bf16.mxu1 %v1202_v4  ;;  %1081 = vmatpush3.bf16.msra.mxu0 %v1196_v11 }
  0x33   :  { %1082 = vmatprep.subr.bf16.mxu0 %v1199_v12 }
  0x35   :  { %1101 = vmatpush3.bf16.msra.mxu1 %v1204_v9 }
  0x36   :  { %1102 = vmatprep.subr.bf16.mxu1 %v1206_v10  ;;  %1083 = vmatpush3.bf16.msra.mxu0 %v1201_v15 }
  0x37   :  { %1084 = vmatprep.subr.bf16.mxu0 %v1203_v17 }
  0x39   :  { %1103 = vmatpush3.bf16.msra.mxu1 %v1208_v13 }
  0x3a   :  { %1104 = vmatprep.subr.bf16.mxu1 %v1210_v14  ;;  %1085 = vmatpush3.bf16.msra.mxu0 %v1205_v20 }
  0x3b   :  { %1086 = vmatprep.subr.bf16.mxu0 %v1207_v21 }
  0x3d   :  { %1105 = vmatpush3.bf16.msra.mxu1 %v1212_v18 }
  0x3e   :  { %1106 = vmatprep.subr.bf16.mxu1 %v1214_v19  ;;  %1087 = vmatpush3.bf16.msra.mxu0 %v1209_v24 }
  0x3f   :  { %1088 = vmatprep.subr.bf16.mxu0 %v1211_v25 }
  0x41   :  { %1107 = vmatpush3.bf16.msra.mxu1 %v1216_v22 }
  0x42   :  { %1108 = vmatprep.subr.bf16.mxu1 %v1218_v23  ;;  %1089 = vmatpush3.bf16.msra.mxu0 %v1213_v28 }
  0x43   :  { %1090 = vmatprep.subr.bf16.mxu0 %v1215_v29 }
  0x45   :  { %1109 = vmatpush3.bf16.msra.mxu1 %v1219_v26 }
  0x46   :  { %1110 = vmatprep.subr.bf16.mxu1 %v1222_v27  ;;  %1091 = vmatpush3.bf16.msra.mxu0 %v1217_v35 }
  0x47   :  { %1120 = vmatprep.subr.bf16.mxu0 %v1220_v40 }
  0x49   :  { %1111 = vmatpush3.bf16.msra.mxu1 %v1223_v30  ;;  %798 = vmatmul.mubr.bf16.vlgmr.msra.gmra.mrb[4].mxu0 %v203_v43 }
  0x4a   :  { %1112 = vmatprep.subr.bf16.mxu1 %v1226_v32  ;;  %1121 = vmatpush3.bf16.msra.mxu0 %v1221_v45 }
  0x4b   :  { %877 = vmatprep.mubr.bf16.mxu0 %v208_v46  ;;  %1122 = vmatprep.subr.bf16.mxu0 %v1224_v47 }
  0x4d   :  { %1113 = vmatpush3.bf16.msra.mxu1 %v1227_v39 }
  0x4e   :  { %1156 = vmatprep.subr.bf16.mxu1 %v1260_v5  ;;  %1123 = vmatpush3.bf16.msra.mxu0 %v1225_v48 }
  0x4f   :  { %1124 = vmatprep.subr.bf16.mxu0 %v1228_v49 }
  0x50   :  { %838 = vmatmul.mubr.bf16.vlgmr.msra.gmra.mrb[4].mxu1 %v205_v44 }
  0x51   :  { %1160 = vmatprep.mubr.msk.bf16.mxu1 %vm1259_vm0, %v1260_v5  ;;  %1157 = vmatpush3.bf16.msra.mxu1 %v1241_v62 }
  0x52   :  { %1125 = vmatpush3.bf16.msra.mxu0 %v1229_v50  ;;  %1158 = vmatprep.subr.bf16.mxu1 %v1260_v5 }
  0x53   :  { %1126 = vmatprep.subr.bf16.mxu0 %v1230_v51 }
  0x55   :  { %1159 = vmatpush3.bf16.msra.mxu1 %v1242_v63 }
  0x56   :  { %1127 = vmatpush3.bf16.msra.mxu0 %v1231_v52 }
  0x57   :  { %1128 = vmatprep.subr.bf16.mxu0 %v1232_v53 }
  0x5a   :  { %1129 = vmatpush3.bf16.msra.mxu0 %v1233_v54 }
  0x5b   :  { %1130 = vmatprep.subr.bf16.mxu0 %v1234_v55 }
  0x5e   :  { %1131 = vmatpush3.bf16.msra.mxu0 %v1235_v56 }
  0x5f   :  { %1132 = vmatprep.subr.bf16.mxu0 %v1236_v57 }
  0x62   :  { %1133 = vmatpush3.bf16.msra.mxu0 %v1237_v58 }
  0x63   :  { %1134 = vmatprep.subr.bf16.mxu0 %v1238_v59 }
  0x66   :  { %1135 = vmatpush3.bf16.msra.mxu0 %v1239_v60 }
  0x69   :  { %878 = vmatmul.mubr.bf16.vlgmr.msra.gmra.mrb[8].mxu0 %v207_v61 }
  0xfc   :  { %v151_v1 = vpop.f32.mrb[0].mxu0 }
  0xfd   :  { %v1155_v3 = vpop.f32.mrb[1].mxu0  ;;  %v340_v6 = vrot.slane %v151_v1, %v339_v0 }
 0x103   :  { %v1070_v2 = vpop.f32.mrb[0].mxu1 }
 0x104   :  { %v1071_v4 = vpop.f32.mrb[1].mxu1 }
 0x105   :  { %v1072_v7 = vadd.f32 %v1071_v4, %v1070_v2  ;;  %v1073_v8 = vpop.f32.mrb[2].mxu1 }
 0x106   :  { %v1074_v9 = vpop.f32.mrb[3].mxu1 }
 0x107   :  { %v760_v10 = vadd.f32 %v1072_v7, %v340_v6 }
 0x11c   :  { %v1092_v11 = vpop.f32.mrb[4].mxu0 }
 0x11d   :  { %v1093_v13 = vpop.f32.mrb[5].mxu0 }
 0x11e   :  { %v1094_v14 = vadd.f32 %v1093_v13, %v1092_v11  ;;  %v1095_v15 = vpop.f32.mrb[6].mxu0 }
 0x11f   :  { %v1096_v19 = vpop.f32.mrb[7].mxu0 }
 0x120   :  { %v800_v38 = vadd.f32 %v1094_v14, %v760_v10 }
 0x123   :  { %v1114_v12 = vpop.f32.mrb[4].mxu1 }
 0x124   :  { %v1115_v5 = vpop.f32.mrb[5].mxu1 }
 0x125   :  { %v1116_v17 = vadd.f32 %v1115_v5, %v1114_v12  ;;  %v1117_v18 = vpop.f32.mrb[6].mxu1 }
 0x126   :  { %v1118_v20 = vpop.f32.mrb[7].mxu1 }
 0x127   :  { %v840_v21 = vadd.f32 %v1116_v17, %v800_v38 }
 0x13c   :  { %v1136_v22 = vpop.f32.mrb[8].mxu0 }
 0x13d   :  { %v1137_v23 = vpop.f32.mrb[9].mxu0 }
 0x13e   :  { %v1138_v24 = vadd.f32 %v1137_v23, %v1136_v22  ;;  %v1139_v25 = vpop.f32.mrb[10].mxu0 }
 0x13f   :  { %v1140_v26 = vpop.f32.mrb[11].mxu0 }
 0x140   :  { %v880_v27 = vadd.f32 %v1138_v24, %v840_v21 }
 0x142   :  { %v885_v28 = vpack.c.bf16 %v880_v27, %v880_v27 }
 0x144   :  { %1161 = vmatmul.mubr.msk.bf16.vlgmr.msra.gmra.mrb[8].mxu1 %vm81_vm9, %v885_v28 }
 0x217   :  { %v939_v29 = vpop.f32.mrb[8].mxu1 }
 0x218   :  { %v946_v30 = vsel %vm945_vm10, %v939_v29, -inf  ;;  %v1162_v31 = vpop.f32.mrb[9].mxu1 }
 0x219   :  { %v942_v32 = vpop.f32.mrb[10].mxu1  ;;  %v948_v33 = vsel %vm947_vm11, %v946_v30, -inf }
 0x21a   :  { %949 = vmax.xlane.f32.xlu0 %v948_v33  ;;  %v1163_v34 = vpop.f32.mrb[11].mxu1 }
 0x2a7   :  { %v950_v35 = vpop.xlane.xlu0 %949 }
 0x2a8   :  { %vm951_vm12 = vcmp.eq.f32.partialorder %v946_v30, %v950_v35 }
 0x2a9   :  { %v952_v36 = vsel %vm951_vm12, %v1333_v16, 128 }
 0x2aa   :  { %v953_v37 = vsel %vm947_vm11, %v952_v36, 2147483647 }
 0x2ab   :  { %v955_v39 = vshra.s32 %v953_v37, 16  ;;  %v954_v41 = vand.u32 65535, %v953_v37 }
 0x2ad   :  { %v957_v40 = vcvt.s32.f32 %v955_v39  ;;  %v956_v43 = vcvt.s32.f32 %v954_v41 }
 0x2af   :  { %958 = vmin.xlane.f32.xlu0 %v957_v40 }
 0x33c   :  { %v959_v42 = vpop.xlane.xlu0 %958 }
 0x33d   :  { %vm960_vm13 = vcmp.eq.f32.partialorder %v957_v40, %v959_v42  ;;  %v965_v45 = vcvt.f32.s32 %v959_v42 }
 0x33e   :  { %v961_v44 = vsel %vm960_vm13, %v956_v43, inf }
 0x33f   :  { %962 = vmin.xlane.f32.xlu1 %v961_v44  ;;  %v966_v47 = vshll.u32 %v965_v45, 16 }
 0x3cc   :  { %v963_v46 = vpop.xlane.xlu1 %962 }
 0x3cd   :  { %v964_v48 = vcvt.f32.s32 %v963_v46 }
 0x3cf   :  { %v967_v49 = vadd.s32 %v966_v47, %v964_v48 }
 0x3d1   :  { %968 = vst [vmem:[%s1569_s5] sm:$0x3] %v967_v49 }
 0x3d2   :  { %973 = vsyncpa [#allocation3], 1 }

</bundles_post_ra>
